<compile_context>
chip_gen: v7x
topology: tpu7x:2x2x1
jax: 0.10.0
libtpu: 0.0.40
codegen_flags: <defaults>
</compile_context>

<pallas_src>
import jax
import jax.numpy as jnp
from jax import lax
from jax.experimental import pallas as pl
from jax.experimental.pallas import tpu as pltpu


def _svm_kernel(x_ref, c_ref, csq_ref, sig_ref, w_ref, b_ref, o_ref):
    # x_ref:   (tN, F_in)   batch tile
    # c_ref:   (Fp, F_in)   RBF centres (rows padded with zeros)
    # csq_ref: (1, Fp)      ||c_o||^2 per centre
    # sig_ref: (1, Fp)      sigmas (padded entries are 0)
    # w_ref:   (Fp, Fp)     linear weight (padded rows/cols are 0)
    # b_ref:   (1, Fp)      linear bias (padded entries are 0)
    # o_ref:   (tN, Fp)
    x = x_ref[...].astype(jnp.float32)                                # (tN, F_in)
    c = c_ref[...].astype(jnp.float32)                                # (Fp, F_in)

    # Squared distances via ||x||^2 + ||c||^2 - 2 x.c  (contraction on the MXU).
    xc = lax.dot_general(x, c, (((1,), (1,)), ((), ())),
                         preferred_element_type=jnp.float32)          # (tN, Fp)
    x2 = jnp.sum(x * x, axis=1, keepdims=True)                        # (tN, 1)
    d2 = jnp.maximum(x2 + csq_ref[...] - 2.0 * xc, 0.0)               # (tN, Fp)

    # RBF: alpha = ||x - c|| * sigma ; gaussian basis phi = exp(-alpha^2)
    alpha = jnp.sqrt(d2) * sig_ref[...]
    phi = jnp.exp(-(alpha * alpha))                                   # (tN, Fp)

    # Linear layer: phi @ W.T + b (second MXU dot; padded cols of W are zero).
    out = lax.dot_general(phi, w_ref[...],
                          (((1,), (1,)), ((), ())),
                          preferred_element_type=jnp.float32)         # (tN, Fp)
    o_ref[...] = (out + b_ref[...]).astype(o_ref.dtype)


def svm_forward(x, centres, sigmas, weight, bias=None, *, block_n=256):
    """Forward pass of SVM (RBF with gaussian basis + Linear).

    x:       (N, in_features)
    centres: (out_features, in_features)
    sigmas:  (out_features,)
    weight:  (out_features, out_features)   Linear weight
    bias:    (out_features,) or None
    returns  (N, out_features)
    """
    N, F_in = x.shape
    F_out = centres.shape[0]
    f32 = jnp.float32

    # Lane-dense padded feature dim (multiple of 128) -> unmasked stores.
    Fp = pl.cdiv(F_out, 128) * 128
    # Batch tile: multiple of 8 sublanes, capped so small batches stay 1 step.
    tN = min(block_n, pl.cdiv(N, 8) * 8)
    Np = pl.cdiv(N, tN) * tN

    x_p = jnp.zeros((Np, F_in), x.dtype).at[:N].set(x)
    c_p = jnp.zeros((Fp, F_in), f32).at[:F_out].set(centres.astype(f32))
    sig_p = jnp.zeros((1, Fp), f32).at[0, :F_out].set(sigmas.astype(f32))
    csq_p = jnp.sum(c_p * c_p, axis=1).reshape(1, Fp)
    w_p = jnp.zeros((Fp, Fp), f32).at[:F_out, :F_out].set(weight.astype(f32))
    if bias is None:
        b = jnp.zeros((F_out,), f32)
    else:
        b = bias.astype(f32)
    b_p = jnp.zeros((1, Fp), f32).at[0, :F_out].set(b)

    out = pl.pallas_call(
        _svm_kernel,
        out_shape=jax.ShapeDtypeStruct((Np, Fp), x.dtype),
        grid_spec=pltpu.PrefetchScalarGridSpec(
            num_scalar_prefetch=0,
            grid=(Np // tN,),
            in_specs=[
                pl.BlockSpec((tN, F_in), lambda i: (i, 0)),   # x tile per grid step
                pl.BlockSpec((Fp, F_in), lambda i: (0, 0)),   # centres (shared)
                pl.BlockSpec((1, Fp), lambda i: (0, 0)),      # ||c||^2 (shared)
                pl.BlockSpec((1, Fp), lambda i: (0, 0)),      # sigmas  (shared)
                pl.BlockSpec((Fp, Fp), lambda i: (0, 0)),     # linear weight (shared)
                pl.BlockSpec((1, Fp), lambda i: (0, 0)),      # linear bias   (shared)
            ],
            out_specs=pl.BlockSpec((tN, Fp), lambda i: (i, 0)),
        ),
        compiler_params=pltpu.CompilerParams(
            dimension_semantics=("parallel",),
        ),
    )(x_p, c_p, csq_p, sig_p, w_p, b_p)

    return out[:N, :F_out]


def _reference(x, centres, sigmas, weight, bias):
    # Pure-JAX mirror of the PyTorch forward (gaussian RBF + Linear).
    xf = x.astype(jnp.float32)
    cf = centres.astype(jnp.float32)
    diff = xf[:, None, :] - cf[None, :, :]
    dist = jnp.sqrt(jnp.sum(diff * diff, axis=-1)) * sigmas.astype(jnp.float32)[None, :]
    phi = jnp.exp(-(dist ** 2))
    out = phi @ weight.astype(jnp.float32).T
    if bias is not None:
        out = out + bias.astype(jnp.float32)
    return out.astype(x.dtype)


if __name__ == "__main__":
    key = jax.random.PRNGKey(0)
    k_x, k_c, k_w, k_b = jax.random.split(key, 4)

    # SVM(in_features=8, out_features=32, bias=True, basis_function='gaussian')
    N, F_in, F_out = 2, 8, 32
    x = jax.random.normal(k_x, (N, F_in), dtype=jnp.float32)

    # RBF params: centres ~ N(0,1), sigmas = 1 (module's reset_parameters)
    centres = jax.random.normal(k_c, (F_out, F_in), dtype=jnp.float32)
    sigmas = jnp.ones((F_out,), dtype=jnp.float32)

    # Linear(out_features, out_features) params, kaiming-uniform-style bound.
    bound = 1.0 / jnp.sqrt(jnp.float32(F_out))
    weight = jax.random.uniform(k_w, (F_out, F_out), minval=-bound, maxval=bound,
                                dtype=jnp.float32)
    bias = jax.random.uniform(k_b, (F_out,), minval=-bound, maxval=bound,
                              dtype=jnp.float32)

    out = svm_forward(x, centres, sigmas, weight, bias)
    out = jax.block_until_ready(out)

    ref = _reference(x, centres, sigmas, weight, bias)
    assert out.shape == (N, F_out)
    assert jnp.allclose(out, ref, atol=1e-4, rtol=1e-4), float(jnp.max(jnp.abs(out - ref)))

    # TODO(synk): only the default 'gaussian' basis function is implemented;
    # the other RBF bases from the module are simple elementwise swaps in-kernel.

    print("KERNEL_OK")
</pallas_src>

<mosaic_0001>
module attributes {stable_mosaic.version = 11 : i64} {
  func.func @_svm_kernel(%arg0: i32, %arg1: memref<8x8xf32, #tpu.memory_space<vmem>>, %arg2: memref<128x8xf32, #tpu.memory_space<vmem>>, %arg3: memref<1x128xf32, #tpu.memory_space<vmem>>, %arg4: memref<1x128xf32, #tpu.memory_space<vmem>>, %arg5: memref<128x128xf32, #tpu.memory_space<vmem>>, %arg6: memref<1x128xf32, #tpu.memory_space<vmem>>, %arg7: memref<8x128xf32, #tpu.memory_space<vmem>>) attributes {dimension_semantics = [#tpu.dimension_semantics<parallel>], iteration_bounds = array<i64: 1>, scalar_prefetch = 0 : i64, scratch_operands = 0 : i64, tpu.core_type = #tpu.core_type<tc>, window_params = [{transform_indices = @transform_0, window_bounds = array<i64: 8, 8>}, {pipeline_mode = #tpu.pipeline_mode<synchronous>, transform_indices = @transform_1, window_bounds = array<i64: 128, 8>}, {pipeline_mode = #tpu.pipeline_mode<synchronous>, transform_indices = @transform_2, window_bounds = array<i64: 1, 128>}, {pipeline_mode = #tpu.pipeline_mode<synchronous>, transform_indices = @transform_3, window_bounds = array<i64: 1, 128>}, {pipeline_mode = #tpu.pipeline_mode<synchronous>, transform_indices = @transform_4, window_bounds = array<i64: 128, 128>}, {pipeline_mode = #tpu.pipeline_mode<synchronous>, transform_indices = @transform_5, window_bounds = array<i64: 1, 128>}, {transform_indices = @transform_6, window_bounds = array<i64: 8, 128>}]} {
    %c0 = arith.constant 0 : index
    %c0_0 = arith.constant 0 : index
    %0 = vector.load %arg1[%c0, %c0_0] : memref<8x8xf32, #tpu.memory_space<vmem>>, vector<8x8xf32>
    %c0_1 = arith.constant 0 : index
    %c0_2 = arith.constant 0 : index
    %1 = vector.load %arg2[%c0_1, %c0_2] : memref<128x8xf32, #tpu.memory_space<vmem>>, vector<128x8xf32>
    %cst = arith.constant dense<0.000000e+00> : vector<8x128xf32>
    %2 = tpu.matmul %0, %1, %cst {dimension_numbers = #tpu.dot_dimension_numbers<[1], [1], [0], [0], [0, 0, 1, 0], [], []>} : vector<8x8xf32>, vector<128x8xf32>, vector<8x128xf32> -> vector<8x128xf32>
    %3 = arith.mulf %0, %0 : vector<8x8xf32>
    %cst_3 = arith.constant dense<0.000000e+00> : vector<8xf32>
    %4 = vector.multi_reduction <add>, %3, %cst_3 [1] : vector<8x8xf32> to vector<8xf32>
    %5 = vector.shape_cast %4 : vector<8xf32> to vector<8x1xf32>
    %c0_4 = arith.constant 0 : index
    %c0_5 = arith.constant 0 : index
    %6 = vector.load %arg3[%c0_4, %c0_5] : memref<1x128xf32, #tpu.memory_space<vmem>>, vector<1x128xf32>
    %7 = vector.broadcast %5 : vector<8x1xf32> to vector<8x128xf32>
    %8 = vector.broadcast %6 : vector<1x128xf32> to vector<8x128xf32>
    %9 = arith.addf %7, %8 : vector<8x128xf32>
    %cst_6 = arith.constant 2.000000e+00 : f32
    %10 = vector.broadcast %cst_6 : f32 to vector<8x128xf32>
    %11 = arith.mulf %10, %2 : vector<8x128xf32>
    %12 = arith.subf %9, %11 : vector<8x128xf32>
    %cst_7 = arith.constant 0.000000e+00 : f32
    %13 = vector.broadcast %cst_7 : f32 to vector<8x128xf32>
    %14 = arith.maximumf %12, %13 : vector<8x128xf32>
    %15 = math.sqrt %14 : vector<8x128xf32>
    %c0_8 = arith.constant 0 : index
    %c0_9 = arith.constant 0 : index
    %16 = vector.load %arg4[%c0_8, %c0_9] : memref<1x128xf32, #tpu.memory_space<vmem>>, vector<1x128xf32>
    %17 = vector.broadcast %16 : vector<1x128xf32> to vector<8x128xf32>
    %18 = arith.mulf %15, %17 : vector<8x128xf32>
    %19 = arith.mulf %18, %18 : vector<8x128xf32>
    %cst_10 = arith.constant 0.000000e+00 : f32
    %20 = vector.broadcast %cst_10 : f32 to vector<8x128xf32>
    %21 = arith.subf %20, %19 : vector<8x128xf32>
    %22 = math.exp %21 : vector<8x128xf32>
    %c0_11 = arith.constant 0 : index
    %c0_12 = arith.constant 0 : index
    %23 = vector.load %arg5[%c0_11, %c0_12] : memref<128x128xf32, #tpu.memory_space<vmem>>, vector<128x128xf32>
    %cst_13 = arith.constant dense<0.000000e+00> : vector<8x128xf32>
    %24 = tpu.matmul %22, %23, %cst_13 {dimension_numbers = #tpu.dot_dimension_numbers<[1], [1], [0], [0], [0, 0, 1, 0], [], []>} : vector<8x128xf32>, vector<128x128xf32>, vector<8x128xf32> -> vector<8x128xf32>
    %c0_14 = arith.constant 0 : index
    %c0_15 = arith.constant 0 : index
    %25 = vector.load %arg6[%c0_14, %c0_15] : memref<1x128xf32, #tpu.memory_space<vmem>>, vector<1x128xf32>
    %26 = vector.broadcast %25 : vector<1x128xf32> to vector<8x128xf32>
    %27 = arith.addf %24, %26 : vector<8x128xf32>
    %c0_16 = arith.constant 0 : index
    %c0_17 = arith.constant 0 : index
    %28 = vector.load %arg7[%c0_16, %c0_17] : memref<8x128xf32, #tpu.memory_space<vmem>>, vector<8x128xf32>
    tpu.vector_store %arg7[%c0_16, %c0_17], %27 {strides = array<i32>} : memref<8x128xf32, #tpu.memory_space<vmem>>, vector<8x128xf32>,
    return
  }
  func.func @transform_0(%arg0: i32) -> (i32, i32) {
    %c0_i32 = arith.constant 0 : i32
    %c0_i32_0 = arith.constant 0 : i32
    return %arg0, %c0_i32 : i32, i32
  }
  func.func @transform_1(%arg0: i32) -> (i32, i32) {
    %c0_i32 = arith.constant 0 : i32
    %c0_i32_0 = arith.constant 0 : i32
    %c0_i32_1 = arith.constant 0 : i32
    return %c0_i32, %c0_i32_0 : i32, i32
  }
  func.func @transform_2(%arg0: i32) -> (i32, i32) {
    %c0_i32 = arith.constant 0 : i32
    %c0_i32_0 = arith.constant 0 : i32
    %c0_i32_1 = arith.constant 0 : i32
    return %c0_i32, %c0_i32_0 : i32, i32
  }
  func.func @transform_3(%arg0: i32) -> (i32, i32) {
    %c0_i32 = arith.constant 0 : i32
    %c0_i32_0 = arith.constant 0 : i32
    %c0_i32_1 = arith.constant 0 : i32
    return %c0_i32, %c0_i32_0 : i32, i32
  }
  func.func @transform_4(%arg0: i32) -> (i32, i32) {
    %c0_i32 = arith.constant 0 : i32
    %c0_i32_0 = arith.constant 0 : i32
    %c0_i32_1 = arith.constant 0 : i32
    return %c0_i32, %c0_i32_0 : i32, i32
  }
  func.func @transform_5(%arg0: i32) -> (i32, i32) {
    %c0_i32 = arith.constant 0 : i32
    %c0_i32_0 = arith.constant 0 : i32
    %c0_i32_1 = arith.constant 0 : i32
    return %c0_i32, %c0_i32_0 : i32, i32
  }
  func.func @transform_6(%arg0: i32) -> (i32, i32) {
    %c0_i32 = arith.constant 0 : i32
    %c0_i32_0 = arith.constant 0 : i32
    return %arg0, %c0_i32 : i32, i32
  }
}

</mosaic_0001>

<bundles_post_ra>
// kernel: tpu_custom_call.1
= control target key start
LH: loop header
LB: loop body
LE: loop exit
PB: predicated region body
PF: predicated region fallthrough
CT: control target
= control target key end

     0   :  { %vm41_vm0 = vcmask 64512   ;;  %v517_v2 = vmov 0.0|0.0   ;;  %vm518_vm2 = vmmov 0   ;;  %v519_v5 = vmov 0.0   ;;  %s716_s0 = inlined_call_operand.vmem [shape: f32[8,8], index: 0, kind: input, shape index: {}]   ;;  %s717_s1 = inlined_call_operand.vmem [shape: f32[128,8], index: 1, kind: input, shape index: {}]   ;;  %s718_s2 = inlined_call_operand.vmem [shape: f32[1,128], index: 2, kind: input, shape index: {}]   ;;  %s719_s3 = inlined_call_operand.vmem [shape: f32[1,128], index: 3, kind: input, shape index: {}]   ;;  %s720_s4 = inlined_call_operand.vmem [shape: f32[128,128], index: 4, kind: input, shape index: {}]   ;;  %s721_s5 = inlined_call_operand.vmem [shape: f32[1,128], index: 5, kind: input, shape index: {}]   ;;  %s722_s6 = inlined_call_operand.hbm [shape: f32[8,128], index: 6, kind: output, shape index: {}]  }
   0x1   :  { %v25_v0 = vld [vmem:[%s717_s1] sm:$0xff]  ;;  %v26_v1 = vld [vmem:[%s717_s1 + $0x8] sm:$0xff]  ;;  %429 = vmatprep.subr.bf16.mxu0 %v517_v2  ;;  %vm565_vm1 = vmpackc.low %vm41_vm0, %vm41_vm0  ;;  %461 = vmatprep.subr.bf16.mxu1 %v517_v2 }
   0x2   :  { %v430_v3 = vpack.c.bf16 %v26_v1, %v25_v0  ;;  %391 = vmatprep.mubr.msk.f32.mxu0 %vm518_vm2, %v519_v5  ;;  %426 = vmatprep.mubr.msk.f32.mxu1 %vm518_vm2, %v519_v5  ;;  %v27_v6 = vld [vmem:[%s717_s1 + $0x10] sm:$0xff]  ;;  %v28_v7 = vld [vmem:[%s717_s1 + $0x18] sm:$0xff]  ;;  %v24_v8 = vld [vmem:[%s716_s0] sm:$0xff] }
   0x3   :  { %v163_v9 = vmul.f32 %v24_v8, %v24_v8  ;;  %v197_v10 = vld [vmem:[%s720_s4] sm:$0xff]  ;;  %v198_v11 = vld [vmem:[%s720_s4 + $0x8] sm:$0xff]  ;;  %v434_v12 = vpack.c.bf16 %v28_v7, %v27_v6 }
   0x4   :  { %432 = vmatpush3.bf16.xpose.msk.msra.mxu0 %vm565_vm1, %v430_v3  ;;  %v462_v13 = vpack.c.bf16 %v198_v11, %v197_v10 }
   0x5   :  { %433 = vmatprep.subr.bf16.mxu0 %v517_v2  ;;  %v164_v14 = vsel %vm41_vm0, %v163_v9, 0.0 }
   0x6   :  { %11 = vsyncpa [#allocation3], 0  ;;  %165 = vadd.xlane.f32.xlu0 %v164_v14  ;;  %463 = vmatpush3.bf16.xpose.msra.mxu1 %v462_v13  ;;  %v199_v15 = vld [vmem:[%s720_s4 + $0x10] sm:$0xff]  ;;  %v200_v16 = vld [vmem:[%s720_s4 + $0x18] sm:$0xff]  ;;  %s520_s15 = smov [#allocation2]  }
   0x7   :  { %464 = vmatprep.subr.bf16.mxu1 %v517_v2  ;;  %v29_v17 = vld [vmem:[%s717_s1 + $0x20] sm:$0xff]  ;;  %v30_v18 = vld [vmem:[%s717_s1 + $0x28] sm:$0xff]  ;;  %v465_v19 = vpack.c.bf16 %v200_v16, %v199_v15  ;;  %v31_v23 = vld [vmem:[%s717_s1 + $0x30] sm:$0xff]  ;;  %s297_s16 = sshll.u32 %s520_s15, 4  ;;  %s298_s16 = int_to_ptr.vmem [resolvable:$true] %s297_s16 }
   0x8   :  { %v438_v20 = vpack.c.bf16 %v30_v18, %v29_v17  ;;  %v201_v21 = vld [vmem:[%s720_s4 + $0x20] sm:$0xff]  ;;  %v202_v22 = vld [vmem:[%s720_s4 + $0x28] sm:$0xff]  ;;  %v32_v24 = vld [vmem:[%s717_s1 + $0x38] sm:$0xff]  ;;  %p498_p1 = scmp.lt.s32.totalorder %s298_s16, %s298_s16 }
   0x9   :  { %v468_v25 = vpack.c.bf16 %v202_v22, %v201_v21  ;;  %v442_v26 = vpack.c.bf16 %v32_v24, %v31_v23  ;;  %v33_v27 = vld [vmem:[%s717_s1 + $0x40] sm:$0xff]  ;;  %v34_v28 = vld [vmem:[%s717_s1 + $0x48] sm:$0xff]  ;;  %v35_v30 = vld [vmem:[%s717_s1 + $0x50] sm:$0xff] }
   0xa   :  { %v446_v29 = vpack.c.bf16 %v34_v28, %v33_v27  ;;  %v36_v31 = vld [vmem:[%s717_s1 + $0x58] sm:$0xff]  ;;  %v37_v33 = vld [vmem:[%s717_s1 + $0x60] sm:$0xff]  ;;  %v38_v34 = vld [vmem:[%s717_s1 + $0x68] sm:$0xff] }
   0xb   :  { %v450_v32 = vpack.c.bf16 %v36_v31, %v35_v30  ;;  %v454_v35 = vpack.c.bf16 %v38_v34, %v37_v33  ;;  %v39_v36 = vld [vmem:[%s717_s1 + $0x70] sm:$0xff]  ;;  %v40_v37 = vld [vmem:[%s717_s1 + $0x78] sm:$0xff]  ;;  %v205_v42 = vld [vmem:[%s720_s4 + $0x40] sm:$0xff] }
   0xc   :  { %436 = vmatpush3.bf16.xpose.msk.msra.mxu0 %vm565_vm1, %v434_v12  ;;  %v458_v38 = vpack.c.bf16 %v40_v37, %v39_v36  ;;  %v203_v39 = vld [vmem:[%s720_s4 + $0x30] sm:$0xff]  ;;  %v204_v40 = vld [vmem:[%s720_s4 + $0x38] sm:$0xff]  ;;  %v206_v43 = vld [vmem:[%s720_s4 + $0x48] sm:$0xff] }
   0xd   :  { %437 = vmatprep.subr.bf16.mxu0 %v517_v2  ;;  %v471_v41 = vpack.c.bf16 %v204_v40, %v203_v39  ;;  %v474_v44 = vpack.c.bf16 %v206_v43, %v205_v42  ;;  %v207_v45 = vld [vmem:[%s720_s4 + $0x50] sm:$0xff]  ;;  %v208_v46 = vld [vmem:[%s720_s4 + $0x58] sm:$0xff]  ;;  %v209_v48 = vld [vmem:[%s720_s4 + $0x60] sm:$0xff] }
   0xe   :  { %466 = vmatpush3.bf16.xpose.msra.mxu1 %v465_v19  ;;  %v477_v47 = vpack.c.bf16 %v208_v46, %v207_v45  ;;  %v210_v49 = vld [vmem:[%s720_s4 + $0x68] sm:$0xff]  ;;  %v211_v51 = vld [vmem:[%s720_s4 + $0x70] sm:$0xff]  ;;  %v212_v52 = vld [vmem:[%s720_s4 + $0x78] sm:$0xff] }
   0xf   :  { %467 = vmatprep.subr.bf16.mxu1 %v517_v2  ;;  %v480_v50 = vpack.c.bf16 %v210_v49, %v209_v48  ;;  %v483_v53 = vpack.c.bf16 %v212_v52, %v211_v51  ;;  %v322_v55 = vld [vmem:[%s718_s2] ss:$0 sm:$0xff] }
  0x10   :  { %v323_v1 = vld [vmem:[%s719_s3] ss:$0 sm:$0xff]  ;;  %s493_s3 = scalar_lea.vmem %s298_s16, 128 }
  0x11   :  { %v324_v9 = vld [vmem:[%s721_s5] ss:$0 sm:$0xff]  ;;  %p494_p0 = scmp.ne.s32.totalorder %s298_s16, %s493_s3  ;;  %p499_p2 = scmp.lt.s32.totalorder %s493_s3, %s493_s3 }
  0x13   :  { %p500_p3 = por %p499_p2, %p498_p1 }
  0x14   :  { %440 = vmatpush3.bf16.xpose.msk.msra.mxu0 %vm565_vm1, %v438_v20 }
  0x15   :  { %441 = vmatprep.subr.bf16.mxu0 %v517_v2  ;;  %p501_p4 = pnand %p500_p3, %p494_p0 }
  0x16   :  { %469 = vmatpush3.bf16.xpose.msra.mxu1 %v468_v25 }
  0x17   :  { %470 = vmatprep.subr.bf16.mxu1 %v517_v2 }
  0x1c   :  { %444 = vmatpush3.bf16.xpose.msk.msra.mxu0 %vm565_vm1, %v442_v26 }
  0x1d   :  { %445 = vmatprep.subr.bf16.mxu0 %v517_v2 }
  0x1e   :  { %472 = vmatpush3.bf16.xpose.msra.mxu1 %v471_v41 }
  0x1f   :  { %473 = vmatprep.subr.bf16.mxu1 %v517_v2 }
  0x24   :  { %448 = vmatpush3.bf16.xpose.msk.msra.mxu0 %vm565_vm1, %v446_v29 }
  0x25   :  { %449 = vmatprep.subr.bf16.mxu0 %v517_v2 }
  0x26   :  { %475 = vmatpush3.bf16.xpose.msra.mxu1 %v474_v44 }
  0x27   :  { %476 = vmatprep.subr.bf16.mxu1 %v517_v2 }
  0x2c   :  { %452 = vmatpush3.bf16.xpose.msk.msra.mxu0 %vm565_vm1, %v450_v32 }
  0x2d   :  { %453 = vmatprep.subr.bf16.mxu0 %v517_v2 }
  0x2e   :  { %478 = vmatpush3.bf16.xpose.msra.mxu1 %v477_v47 }
  0x2f   :  { %479 = vmatprep.subr.bf16.mxu1 %v517_v2 }
  0x34   :  { %456 = vmatpush3.bf16.xpose.msk.msra.mxu0 %vm565_vm1, %v454_v35 }
  0x35   :  { %457 = vmatprep.subr.bf16.mxu0 %v517_v2 }
  0x36   :  { %481 = vmatpush3.bf16.xpose.msra.mxu1 %v480_v50 }
  0x37   :  { %482 = vmatprep.subr.bf16.mxu1 %v517_v2 }
  0x3c   :  { %460 = vmatpush3.bf16.xpose.msk.msra.mxu0 %vm565_vm1, %v458_v38 }
  0x3e   :  { %484 = vmatpush3.bf16.xpose.msra.mxu1 %v483_v53 }
  0x43   :  { %392 = vmatmul.mubr.msk.f32.vlgmr.msra.gmra.mrb[0].mxu0 %vm41_vm0, %v24_v8 }
  0x93   :  { %v166_v54 = vpop.xlane.xlu0 %165 }
  0x94   :  { %v174_v56 = vadd.f32 %v322_v55, %v166_v54 }
 0x116   :  { %v159_v57 = vpop.f32.mrb[0].mxu0 }
 0x117   :  { %v175_v58 = vmul.f32 2.0, %v159_v57  ;;  %v393_v59 = vpop.f32.mrb[1].mxu0 }
 0x119   :  { %v176_v60 = vsub.f32 %v174_v56, %v175_v58 }
 0x11b   :  { %v177_v61 = vmax.f32 %v176_v60, 0.0 }
 0x11d   :  { %489 = vrsqrt.f32 %v177_v61  ;;  %vm180_vm3 = vcmp.eq.f32.partialorder %v177_v61, inf  ;;  %v183_v0 = vand.u32 2147483648, %v177_v61  ;;  %vm182_vm4 = vcmp.eq.f32.partialorder %v177_v61, 0.0 }
 0x127   :  { %v490_v62 = vpop.eup %489 }
 0x128   :  { %v179_v63 = vmul.f32 %v490_v62, %v177_v61 }
 0x12a   :  { %v181_v2 = vsel %vm180_vm3, %v177_v61, %v179_v63 }
 0x12b   :  { %v184_v3 = vsel %vm182_vm4, %v183_v0, %v181_v2 }
 0x12c   :  { %v192_v4 = vmul.f32 %v323_v1, %v184_v3 }
 0x12e   :  { %v193_v5 = vmul.f32 %v192_v4, %v192_v4 }
 0x130   :  { %v194_v6 = vsub.f32 0.0, %v193_v5 }
 0x132   :  { %v195_v7 = vmul.f32 1.442695, %v194_v6 }
 0x134   :  { %491 = vpow2.f32 %v195_v7 }
 0x13e   :  { %v492_v8 = vpop.eup %491 }
 0x13f   :  { %427 = vmatmul.mubr.f32.vlgmr.msra.gmra.mrb[0].mxu1 %v492_v8 }
 0x212   :  { %v286_v10 = vpop.f32.mrb[0].mxu1 }
 0x213   :  { %v287_v11 = vadd.f32 %v324_v9, %v286_v10  ;;  %v428_v12 = vpop.f32.mrb[1].mxu1 }
 0x215   :  { %290 = vst [vmem:[#allocation2] sm:$0xff] %v287_v11 }
 0x216   :  { %504 = shalt.err (!%p501_p4)
}
 0x217   :  { %s505_s19 = scalar_lea.hbm %s722_s6, 128 }
 0x218   :  { %p506_p5 = scmp.ne.s32.totalorder %s722_s6, %s505_s19  ;;  %p509_p6 = scmp.lt.u32.totalorder %s505_s19, %s722_s6 }
 0x21a   :  { %p511_p7 = pnand %p509_p6, %p506_p5 }
 0x21c   :  { %514 = shalt.err (!%p511_p7)
}
 0x21d   :  { %300 = dma.vmem_to_hbm [thread:$0]  %s298_s16, 128, %s722_s6, [#allocation3]  }
 0x21e   :  { %515 = dma.done.wait [#allocation3], 128  }
 0x21f   :  { %516 = vsyncadd [#allocation3], 4294967168 }
 0x220   :  { %304 = vsyncpa [#allocation3], 1 }

</bundles_post_ra>
